<compile_context>
chip_gen: v5e
topology: v5e:2x2
jax: 0.10.0
libtpu: 0.0.40
codegen_flags: <defaults>
</compile_context>

<pallas_src>
import jax
import jax.numpy as jnp
from jax.experimental import pallas as pl
from jax.experimental.pallas import tpu as pltpu


# ---------------------------------------------------------------------------
# Kernel body: one batch tile per grid step.
# ---------------------------------------------------------------------------
def _linear_kernel(x_ref, w_ref, b_ref, o_ref):
    # x_ref: [TM, H]   w_ref: [H, Lp]   b_ref: [1, Lp] (f32)   o_ref: [TM, Lp]
    acc = jnp.dot(x_ref[...], w_ref[...], preferred_element_type=jnp.float32)
    o_ref[...] = (acc + b_ref[...]).astype(o_ref.dtype)


# ---------------------------------------------------------------------------
# Tiling / VMEM planning.
# ---------------------------------------------------------------------------
_VMEM_BUDGET_BYTES = 48 * 1024 * 1024   # fits v7x's 64 MiB physical VMEM w/ headroom
_SMALL_FAST_PATH_ELEMS = 1 << 18        # B*H*L below this -> plain XLA dot


def _round_up(v, m):
    return ((v + m - 1) // m) * m


def _pick_tile_and_vmem(B, H, L_pad, in_itemsize, out_itemsize, single_buffer_resident):
    """Pick the batch tile TM and a matching vmem_limit_bytes.

    Budgets ALL VMEM residents: double-buffered x tile, double-buffered output
    tile, the resident (optionally single-buffered) weight and the bias.
    """
    w_bufs = 1 if single_buffer_resident else 2
    resident = w_bufs * (L_pad * H * in_itemsize + L_pad * 4)       # weight + f32 bias
    per_row = 2 * (H * in_itemsize + L_pad * out_itemsize)          # 2x x-tile + 2x out-tile

    avail = max(_VMEM_BUDGET_BYTES - resident, 0)
    tm = avail // per_row if per_row else 8
    tm = max(8, min(2048, (tm // 8) * 8))                           # big tiles on v5e/v6e too

    b_pad8 = _round_up(B, 8)
    tm = min(tm, b_pad8)
    if b_pad8 >= 16:
        # v7x megacore: guarantee >= 2 grid steps so both TensorCores get work.
        tm = min(tm, _round_up((b_pad8 + 1) // 2, 8))
    tm = max(tm, 8)

    footprint = resident + tm * per_row
    # 25% headroom for Mosaic internal scratch; never below 32 MiB, never an
    # absurd request (physical VMEM is 64 MiB on v7x / 128 MiB on v5e/v6e).
    vmem_limit = int(min(max(footprint + footprint // 4, 32 * 1024 * 1024),
                         100 * 1024 * 1024))
    # TODO(synk): tile over L/H when the weight alone exceeds the budget
    # (not typical for a classification head).
    return tm, vmem_limit


# ---------------------------------------------------------------------------
# Public entry point (nn.Linear.forward semantics).
# ---------------------------------------------------------------------------
def classification_head(x, weight, bias, *, compute_dtype=None, force_pallas=False):
    """y = x @ weight.T + bias.

    x:      [B, H]
    weight: [L, H]  (PyTorch nn.Linear layout)
    bias:   [L]
    compute_dtype: optional bf16 cast of x/W (f32 accumulation kept); gate on
                   model numerics tolerance.
    returns [B, L] in x.dtype.
    """
    B, H = x.shape
    L = weight.shape[0]
    out_dtype = x.dtype

    # Tiny heads: pallas_call launch + pipeline prologue dwarf the ~kFLOPs.
    if not force_pallas and (B < 8 or B * H * L <= _SMALL_FAST_PATH_ELEMS):
        return (x @ weight.T + bias).astype(out_dtype)

    L_pad = _round_up(L, 128)   # lane-dense output stores

    # One-time HBM-side weight prep: transpose to [H, L_pad] so the kernel is
    # a plain NN contraction (no per-step XLU transpose of the resident W).
    # TODO(synk): in a real model, pre-transpose / pre-pad weight and bias
    # once at parameter init time instead of per call.
    w_t = weight.T
    b_f32 = bias.astype(jnp.float32)
    if L_pad != L:
        w_t = jnp.pad(w_t, ((0, 0), (0, L_pad - L)))
        b_f32 = jnp.pad(b_f32, (0, L_pad - L))
    b2 = b_f32.reshape(1, L_pad)

    if compute_dtype is not None:
        x_in = x.astype(compute_dtype)
        w_t = w_t.astype(compute_dtype)
    else:
        x_in = x

    in_itemsize = jnp.dtype(x_in.dtype).itemsize
    out_itemsize = jnp.dtype(out_dtype).itemsize

    def _call(single_buffer_resident):
        TM, vmem_limit = _pick_tile_and_vmem(
            B, H, L_pad, in_itemsize, out_itemsize, single_buffer_resident)
        grid = (pl.cdiv(B, TM),)   # no x padding; ragged tail tile is clipped

        resident_kwargs = (
            dict(pipeline_mode=pl.Buffered(1)) if single_buffer_resident else {}
        )
        return pl.pallas_call(
            _linear_kernel,
            out_shape=jax.ShapeDtypeStruct((B, L_pad), out_dtype),
            grid_spec=pltpu.PrefetchScalarGridSpec(
                num_scalar_prefetch=0,
                grid=grid,
                in_specs=[
                    pl.BlockSpec((TM, H), lambda i: (i, 0)),        # streamed x tiles
                    pl.BlockSpec((H, L_pad), lambda i: (0, 0),      # resident W^T
                                 **resident_kwargs),
                    pl.BlockSpec((1, L_pad), lambda i: (0, 0),      # resident bias
                                 **resident_kwargs),
                ],
                out_specs=pl.BlockSpec((TM, L_pad), lambda i: (i, 0)),
            ),
            compiler_params=pltpu.CompilerParams(
                dimension_semantics=("parallel",),   # shards tiles on v7x dual-TC
                vmem_limit_bytes=vmem_limit,
            ),
        )(x_in, w_t, b2)

    try:
        out = _call(single_buffer_resident=True)
    except Exception:
        # Fallback for JAX versions where pipeline_mode=pl.Buffered(1) is not
        # supported: default double-buffering of the resident weight/bias
        # (budget is recomputed accordingly).
        out = _call(single_buffer_resident=False)

    return out[:, :L]


# ---------------------------------------------------------------------------
# Self-test.
# ---------------------------------------------------------------------------
if __name__ == "__main__":
    H, L = 32, 10   # hidden_size=32, num_labels=10
    key = jax.random.PRNGKey(0)
    bound = 1.0 / (H ** 0.5)

    def make_inputs(batch, k):
        kx, kw, kb = jax.random.split(k, 3)
        x = jax.random.normal(kx, (batch, H), dtype=jnp.float32)
        # nn.Linear-style init: U(-1/sqrt(H), 1/sqrt(H)).
        w = jax.random.uniform(kw, (L, H), jnp.float32, -bound, bound)
        b = jax.random.uniform(kb, (L,), jnp.float32, -bound, bound)
        return x, w, b

    k_small, k_big = jax.random.split(key)

    # Case 1: tiny batch consistent with the module -> small-shape fast path.
    x1, w1, b1 = make_inputs(2, k_small)
    y1 = classification_head(x1, w1, b1)
    jax.block_until_ready(y1)
    assert y1.shape == (2, L)
    assert jnp.allclose(y1, x1 @ w1.T + b1, atol=1e-5, rtol=1e-5)

    # Case 2: ragged batch forced through the Pallas path
    # (multi-step grid, resident weight, clipped tail tile).
    x2, w2, b2 = make_inputs(20, k_big)
    y2 = classification_head(x2, w2, b2, force_pallas=True)
    jax.block_until_ready(y2)
    assert y2.shape == (20, L)
    assert jnp.allclose(y2, x2 @ w2.T + b2, atol=1e-5, rtol=1e-5)

    print("KERNEL_OK")
</pallas_src>

<mosaic_0001>
module attributes {stable_mosaic.version = 11 : i64} {
  func.func @_linear_kernel(%arg0: i32, %arg1: memref<16x32xf32, #tpu.memory_space<vmem>>, %arg2: memref<32x128xf32, #tpu.memory_space<vmem>>, %arg3: memref<1x128xf32, #tpu.memory_space<vmem>>, %arg4: memref<16x128xf32, #tpu.memory_space<vmem>>) attributes {dimension_semantics = [#tpu.dimension_semantics<parallel>], iteration_bounds = array<i64: 2>, scalar_prefetch = 0 : i64, scratch_operands = 0 : i64, tpu.core_type = #tpu.core_type<tc>, window_params = [{transform_indices = @transform_0, window_bounds = array<i64: 16, 32>}, {pipeline_mode = #tpu.pipeline_mode<synchronous>, transform_indices = @transform_1, window_bounds = array<i64: 32, 128>}, {pipeline_mode = #tpu.pipeline_mode<synchronous>, transform_indices = @transform_2, window_bounds = array<i64: 1, 128>}, {transform_indices = @transform_3, window_bounds = array<i64: 16, 128>}]} {
    %c0 = arith.constant 0 : index
    %c0_0 = arith.constant 0 : index
    %0 = vector.load %arg1[%c0, %c0_0] : memref<16x32xf32, #tpu.memory_space<vmem>>, vector<16x32xf32>
    %c0_1 = arith.constant 0 : index
    %c0_2 = arith.constant 0 : index
    %1 = vector.load %arg2[%c0_1, %c0_2] : memref<32x128xf32, #tpu.memory_space<vmem>>, vector<32x128xf32>
    %cst = arith.constant dense<0.000000e+00> : vector<16x128xf32>
    %2 = tpu.matmul %0, %1, %cst {dimension_numbers = #tpu.dot_dimension_numbers<[1], [0], [0], [1], [0, 0, 1, 1], [], []>} : vector<16x32xf32>, vector<32x128xf32>, vector<16x128xf32> -> vector<16x128xf32>
    %c0_3 = arith.constant 0 : index
    %c0_4 = arith.constant 0 : index
    %3 = vector.load %arg3[%c0_3, %c0_4] : memref<1x128xf32, #tpu.memory_space<vmem>>, vector<1x128xf32>
    %4 = vector.broadcast %3 : vector<1x128xf32> to vector<16x128xf32>
    %5 = arith.addf %2, %4 : vector<16x128xf32>
    %c0_5 = arith.constant 0 : index
    %c0_6 = arith.constant 0 : index
    %6 = vector.load %arg4[%c0_5, %c0_6] : memref<16x128xf32, #tpu.memory_space<vmem>>, vector<16x128xf32>
    tpu.vector_store %arg4[%c0_5, %c0_6], %5 {strides = array<i32>} : memref<16x128xf32, #tpu.memory_space<vmem>>, vector<16x128xf32>,
    return
  }
  func.func @transform_0(%arg0: i32) -> (i32, i32) {
    %c0_i32 = arith.constant 0 : i32
    %c0_i32_0 = arith.constant 0 : i32
    return %arg0, %c0_i32 : i32, i32
  }
  func.func @transform_1(%arg0: i32) -> (i32, i32) {
    %c0_i32 = arith.constant 0 : i32
    %c0_i32_0 = arith.constant 0 : i32
    %c0_i32_1 = arith.constant 0 : i32
    return %c0_i32, %c0_i32_0 : i32, i32
  }
  func.func @transform_2(%arg0: i32) -> (i32, i32) {
    %c0_i32 = arith.constant 0 : i32
    %c0_i32_0 = arith.constant 0 : i32
    %c0_i32_1 = arith.constant 0 : i32
    return %c0_i32, %c0_i32_0 : i32, i32
  }
  func.func @transform_3(%arg0: i32) -> (i32, i32) {
    %c0_i32 = arith.constant 0 : i32
    %c0_i32_0 = arith.constant 0 : i32
    return %arg0, %c0_i32 : i32, i32
  }
}

module attributes {stable_mosaic.version = 11 : i64} {
  func.func @_linear_kernel(%arg0: i32, %arg1: memref<16x32xf32, #tpu.memory_space<vmem>>, %arg2: memref<32x128xf32, #tpu.memory_space<vmem>>, %arg3: memref<1x128xf32, #tpu.memory_space<vmem>>, %arg4: memref<16x128xf32, #tpu.memory_space<vmem>>) attributes {dimension_semantics = [#tpu.dimension_semantics<parallel>], iteration_bounds = array<i64: 2>, scalar_prefetch = 0 : i64, scratch_operands = 0 : i64, tpu.core_type = #tpu.core_type<tc>, window_params = [{transform_indices = @transform_0, window_bounds = array<i64: 16, 32>}, {pipeline_mode = #tpu.pipeline_mode<synchronous>, transform_indices = @transform_1, window_bounds = array<i64: 32, 128>}, {pipeline_mode = #tpu.pipeline_mode<synchronous>, transform_indices = @transform_2, window_bounds = array<i64: 1, 128>}, {transform_indices = @transform_3, window_bounds = array<i64: 16, 128>}]} {
    %c0 = arith.constant 0 : index
    %c0_0 = arith.constant 0 : index
    %0 = vector.load %arg1[%c0, %c0_0] : memref<16x32xf32, #tpu.memory_space<vmem>>, vector<16x32xf32>
    %c0_1 = arith.constant 0 : index
    %c0_2 = arith.constant 0 : index
    %1 = vector.load %arg2[%c0_1, %c0_2] : memref<32x128xf32, #tpu.memory_space<vmem>>, vector<32x128xf32>
    %cst = arith.constant dense<0.000000e+00> : vector<16x128xf32>
    %2 = tpu.matmul %0, %1, %cst {dimension_numbers = #tpu.dot_dimension_numbers<[1], [0], [0], [1], [0, 0, 1, 1], [], []>} : vector<16x32xf32>, vector<32x128xf32>, vector<16x128xf32> -> vector<16x128xf32>
    %c0_3 = arith.constant 0 : index
    %c0_4 = arith.constant 0 : index
    %3 = vector.load %arg3[%c0_3, %c0_4] : memref<1x128xf32, #tpu.memory_space<vmem>>, vector<1x128xf32>
    %4 = vector.broadcast %3 : vector<1x128xf32> to vector<16x128xf32>
    %5 = arith.addf %2, %4 : vector<16x128xf32>
    %c0_5 = arith.constant 0 : index
    %c0_6 = arith.constant 0 : index
    %6 = vector.load %arg4[%c0_5, %c0_6] : memref<16x128xf32, #tpu.memory_space<vmem>>, vector<16x128xf32>
    tpu.vector_store %arg4[%c0_5, %c0_6], %5 {strides = array<i32>} : memref<16x128xf32, #tpu.memory_space<vmem>>, vector<16x128xf32>,
    return
  }
  func.func @transform_0(%arg0: i32) -> (i32, i32) {
    %c0_i32 = arith.constant 0 : i32
    %c0_i32_0 = arith.constant 0 : i32
    return %arg0, %c0_i32 : i32, i32
  }
  func.func @transform_1(%arg0: i32) -> (i32, i32) {
    %c0_i32 = arith.constant 0 : i32
    %c0_i32_0 = arith.constant 0 : i32
    %c0_i32_1 = arith.constant 0 : i32
    return %c0_i32, %c0_i32_0 : i32, i32
  }
  func.func @transform_2(%arg0: i32) -> (i32, i32) {
    %c0_i32 = arith.constant 0 : i32
    %c0_i32_0 = arith.constant 0 : i32
    %c0_i32_1 = arith.constant 0 : i32
    return %c0_i32, %c0_i32_0 : i32, i32
  }
  func.func @transform_3(%arg0: i32) -> (i32, i32) {
    %c0_i32 = arith.constant 0 : i32
    %c0_i32_0 = arith.constant 0 : i32
    return %arg0, %c0_i32 : i32, i32
  }
}

</mosaic_0001>

<bundles_post_ra>
// kernel: tpu_custom_call.1
= control target key start
LH: loop header
LB: loop body
LE: loop exit
PB: predicated region body
PF: predicated region fallthrough
CT: control target
= control target key end

     0   :  { %8 = vsyncpa [#allocation3], 0  ;;  %s844_s0 = inlined_call_operand.hbm [shape: f32[20,32], index: 0, kind: input, shape index: {}]   ;;  %s845_s1 = inlined_call_operand.hbm [shape: f32[32,128], index: 1, kind: input, shape index: {}]   ;;  %s846_s2 = inlined_call_operand.vmem [shape: f32[1,128], index: 2, kind: input, shape index: {}]   ;;  %s847_s3 = inlined_call_operand.hbm [shape: f32[20,128], index: 3, kind: output, shape index: {}]  }
   0x1   :  { %10 = vsyncpa [#allocation3 + $0x1], 0 }
   0x2   :  { %11 = vsyncpa [#allocation6], 0 }
   0x3   :  { %12 = vsyncpa [#allocation4], 0 }
   0x4   :  { %14 = vsyncpa [#allocation4 + $0x1], 0  ;;  %s643_s12 = smov 0   ;;  %s645_s13 = smov 0  }
   0x5   :  { %s647_s14 = smov 0   ;;  %s649_s15 = smov 0  }
   0x6 LB: > { %s664_s16 = sadd.s32 4294967295, %s612_s15   ;;  %s373_s17 = sadd.s32 4294967294, %s612_s15   ;;  %s612_s15 = sphi %s649_s15, %s864_s15   ;;  %s608_s14 = sphi %s647_s14, %s863_s14   ;;  %s604_s13 = sphi %s645_s13, %s862_s13   ;;  %s600_s12 = sphi %s643_s12, %s861_s12  }
   0x7   : > { %s668_s18 = sadd.s32 1, %s612_s15   ;;  %s27_s19 = sadd.s32 1, %s608_s14 }
   0x8   : > { %s24_s20 = ssub.s32 %s612_s15, %s668_s18  ;;  %p34_p0 = scmp.ne.s32.totalorder %s608_s14, %s604_s13 }
   0x9   : > { %p25_p1 = scmp.eq.s32.totalorder %s24_s20, 0  ;;  %p35_p2 = scmp.eq.s32.totalorder %s612_s15, 0 }
   0xa   : > { %p40_p3 = scmp.ne.s32.totalorder %s604_s13, %s600_s12  ;;  %p849_p4 = scmp.eq.s32.totalorder %s664_s16, 0 }
   0xb   : > { %s680_s21 = scalar_select %p25_p1, %s608_s14, %s27_s19  }
   0xc   : > { %p682_p5 = por %p35_p2, %p34_p0  ;;  %p688_p6 = por %p849_p4, %p40_p3 }
   0xd   : > { %p106_p7 = scmp.eq.s32.totalorder %s664_s16, 1  ;;  %p112_p8 = scmp.eq.s32.totalorder %s373_s17, 1 }
   0xe   : > { %p374_p9 = scmp.ge.s32.totalorder %s612_s15, 1  ;;  %p119_p10 = scmp.lt.s32.totalorder %s612_s15, 3 }
   0xf   : > { %p695_p11 = por %p106_p7, %p34_p0  ;;  %p699_p12 = por %p112_p8, %p40_p3 }
  0x10   : > { %p703_p13 = pnand %p374_p9, %p119_p10  ;;  %s130_s29 = sshll.u32 %s845_s1, 4  ;;  %s131_s29 = int_to_ptr.hbm [resolvable:$true] %s130_s29 }
  0x11   : > { %s853_s25 = scalar_select %p699_p12, 1, 0 }
  0x12   : > { %p411_p1 = pneg %p703_p13  ;;  %s614_s30 = smov [#allocation5]  }
  0x13   : > { %s132_s4 = sshll.u32 %s614_s30, 4  ;;  %s615_s5 = smov 128   ;;  %s133_s4 = int_to_ptr.vmem [resolvable:$true] %s132_s4 }
  0x14   : > { %p412_p0 = pnand %p411_p1, %p849_p4  ;;  %s616_s6 = smov 8  }
  0x15   : > { %p848_p2 = scmp.ge.s32.totalorder %s612_s15, 2 }
  0x16   : > { %414 = dma.hbm_to_vmem [thread:$0]  (!%p412_p0), %s131_s29, 512, %s133_s4, [#allocation6], %s615_s5, %s615_s5, %s616_s6  }
  0x17   : > { %145 = sbr.rel (%p848_p2) target bundleno = 64 (0x40), region = 24 }
  0x1c   : > { %148 = sbr.rel (!%p682_p5) target bundleno = 64 (0x40), region = 28  ;;  %s149_s7 = sand.u32 (%p682_p5), 1, %s608_s14  }
  0x1d   : > { %s378_s8 = sshll.u32 (%p682_p5), %s612_s15, 1  ;;  %s377_s9 = sshll.u32 (%p682_p5), %s149_s7, 4 }
  0x1e   : > { %s155_s10 = ssub.s32 (%p682_p5), 3, %s378_s8  ;;  %s724_s20 = scalar_lea.sflag (%p682_p5), [#allocation3], %s149_s7 }
  0x1f   : > { %p156_p3 = scmp.lt.s32.totalorder (%p682_p5), %s155_s10, 2  ;;  %s153_s27 = scalar_lea.vmem (%p682_p5), [#allocation2], %s377_s9 }
  0x21   : > { %s866_s10 = smov (!%p156_p3, %s155_s10), 2 }
  0x22   : > { %s379_s11 = sshll.u32 %s866_s10, 3 }
  0x23   : > { %s159_s17 = ssub.s32 16, %s379_s11 }
  0x24   : > { %s160_s19 = sshll.u32 %s159_s17, 4 }
  0x25   : > { %161 = vsyncadd %s724_s20, %s160_s19  ;;  %p727_p5 = scmp.ne.s32.totalorder %s379_s11, 0  ;;  %s399_s28 = sshll.u32 %s612_s15, 4 }
  0x26   : > { %s164_s4 = scalar_lea.hbm %s844_s0, %s399_s28  ;;  %s735_s5 = sshll.u32 %s153_s27, 4  ;;  %s169_s5 = int_to_ptr.vmem [resolvable:$true] %s735_s5 }
  0x27   : > { %s166_s6 = sshll.u32 %s164_s4, 4  ;;  %s383_s7 = sshll.u32 %s866_s10, 7  ;;  %s738_s6 = int_to_ptr.hbm [resolvable:$true] %s166_s6 }
  0x28   : > { %s492_s8 = sshra.s32 %s738_s6, 4  ;;  %s494_s9 = sshrl.u32 %s383_s7, 4  ;;  %s493_s8 = int_to_ptr.hbm [resolvable:$true] %s492_s8 }
  0x29   : > { %s499_s11 = scalar_lea.hbm %s493_s8, %s494_s9  ;;  %s503_s27 = scalar_lea.hbm %s844_s0, 24 }
  0x2a   : > { %p500_p7 = scmp.ne.s32.totalorder %s493_s8, %s499_s11  ;;  %p504_p10 = scmp.lt.s32.totalorder %s493_s8, %s844_s0 }
  0x2b   : > { %p505_p1 = scmp.lt.s32.totalorder %s503_s27, %s499_s11 }
  0x2c   : > { %p501_p8 = pnand %p500_p7, %p727_p5 }
  0x2d   : > { %p506_p0 = por %p505_p1, %p504_p10 }
  0x2e   : > { %p502_p9 = pneg %p501_p8 }
  0x30   : > { %p507_p3 = pnand %p506_p0, %p502_p9 }
  0x32   : > { %510 = shalt.err (!%p507_p3)
}
  0x33   : > { %s511_s30 = sshra.s32 %s169_s5, 4  ;;  %s617_s17 = smov [#allocation2]   ;;  %s512_s30 = int_to_ptr.vmem [resolvable:$true] %s511_s30 }
  0x34   : > { %s518_s4 = scalar_lea.vmem %s512_s30, %s494_s9  ;;  %s522_s19 = scalar_lea.vmem %s617_s17, 32 }
  0x35   : > { %p519_p7 = scmp.ne.s32.totalorder %s512_s30, %s518_s4  ;;  %p524_p4 = scmp.lt.s32.totalorder %s522_s19, %s518_s4 }
  0x37   : > { %p520_p8 = pnand %p519_p7, %p727_p5 }
  0x39   : > { %p521_p2 = pneg %p520_p8 }
  0x3b   : > { %p526_p12 = pnand %p524_p4, %p521_p2 }
  0x3d   : > { %529 = shalt.err (!%p526_p12)
}
  0x3e   : > { %s618_s8 = smov 128   ;;  %s619_s11 = smov 8  }
  0x3f   : > { %174 = dma.hbm_to_vmem [thread:$0]  (%p727_p5), %s738_s6, %s383_s7, %s169_s5, %s724_s20, %s618_s8, %s618_s8, %s619_s11  }
  0x40 PF: > { %180 = sbr.rel (%p703_p13) target bundleno = 242 (0xf2), region = 32  ;;  %s767_s9 = sand.u32 (!%p703_p13), 1, %s604_s13  }
  0x41   : > { %s385_s27 = sshll.u32 (!%p703_p13), %s767_s9, 4  ;;  %s183_s28 = scalar_lea.sflag (!%p703_p13), [#allocation3], %s767_s9 }
  0x42   : > { %s186_s29 = scalar_lea.vmem (!%p703_p13), [#allocation2], %s385_s27 }
  0x45   : > { %587 = dma.done.wait (%p688_p6), %s183_s28, 256  }
  0x46   : > { %589 = vsyncadd (%p688_p6), %s183_s28, 4294967040  ;;  %p856_p4 = scmp.eq.s32.totalorder %s664_s16, 0 }
  0x48   : > { %591 = dma.done.wait (%p856_p4), [#allocation6], 512   ;;  %p857_p12 = pmov %p856_p4 }
  0x49   : > { %v230_v0 = vld [vmem:[#allocation5 + $0x18] sm:$0xff]  ;;  %v229_v1 = vld [vmem:[#allocation5 + $0x10] sm:$0xff]  ;;  %v228_v2 = vld [vmem:[#allocation5 + $0x8] sm:$0xff]  ;;  %vm235_vm0 = vcmask 261120   ;;  %s214_s10 = scalar_lea.vmem [#allocation7], %s385_s27  ;;  %s268_s20 = scalar_lea.sflag [#allocation4], %s767_s9 }
  0x4a   : > { %593 = vsyncadd (%p857_p12), [#allocation6], 4294966784  ;;  %254 = vmatpush.msra.mxu0 %v230_v0  ;;  %401 = vmatpush.msra.mxu1 %v230_v0  ;;  %v227_v3 = vld [vmem:[#allocation5] sm:$0xff]  ;;  %v226_v5 = vld [vmem:[%s186_s29 + $0x8] sm:$0xff]  ;;  %s391_s22 = sshll.u32 (%p695_p11), %s664_s16, 1 }
  0x4b   : > { %v225_v4 = vld [vmem:[%s186_s29] sm:$0xff]  ;;  %s276_s5 = ssub.s32 (%p695_p11), 3, %s391_s22 }
  0x4c   : > { %255 = vmatpush.msra.mxu0 %v229_v1  ;;  %402 = vmatpush.msra.mxu1 %v229_v1  ;;  %v461_v6 = vld [vmem:[%s846_s2] ss:$0 sm:$0xff]  ;;  %p277_p6 = scmp.lt.s32.totalorder (%p695_p11), %s276_s5, 2 }
  0x4e   : > { %256 = vmatpush.msra.mxu0 %v228_v2  ;;  %403 = vmatpush.msra.mxu1 %v228_v2 }
  0x50   : > { %257 = vmatpush.msra.mxu0 %v227_v3  ;;  %404 = vmatpush.msra.mxu1 %v227_v3 }
  0x51   : > { %388 = vmatmul.msk.f32.vlgmr.msra.gmra.mxu0 %vm235_vm0, %v225_v4  ;;  %389 = vmatmul.msk.f32.vlgmr.msra.gmra.mxu1 %vm235_vm0, %v226_v5 }
  0xce   : > { %v259_v7 = vpop.f32.mrf.mxu0  ;;  %v262_v8 = vpop.f32.mrf.mxu1  ;;  %274 = sbr.rel (!%p695_p11) target bundleno = 242 (0xf2), region = 44 }
  0xcf   : > { %v260_v9 = vadd.f32 %v461_v6, %v259_v7  ;;  %v263_v10 = vadd.f32 %v461_v6, %v262_v8 }
  0xd1   : > { %265 = vst [vmem:[%s214_s10] sm:$0xff] %v260_v9 }
  0xd2   : > { %266 = vst [vmem:[%s214_s10 + $0x8] sm:$0xff] %v263_v10 }
  0xd3   : > { %s868_s5 = smov (!%p277_p6, %s276_s5), 2 }
  0xd4   : > { %s392_s6 = sshll.u32 %s868_s5, 3 }
  0xd5   : > { %s280_s7 = ssub.s32 16, %s392_s6 }
  0xd6   : > { %s281_s30 = sshll.u32 %s280_s7, 4 }
  0xd7   : > { %282 = vsyncadd %s268_s20, %s281_s30  ;;  %p791_p13 = scmp.ne.s32.totalorder %s392_s6, 0  ;;  %s400_s24 = sshll.u32 %s664_s16, 4 }
  0xd8   : > { %s285_s8 = scalar_lea.hbm %s847_s3, %s400_s24  ;;  %s287_s11 = sshll.u32 %s214_s10, 4  ;;  %s799_s11 = int_to_ptr.vmem [resolvable:$true] %s287_s11 }
  0xd9   : > { %s289_s27 = sshll.u32 %s285_s8, 4  ;;  %s396_s28 = sshll.u32 %s868_s5, 7  ;;  %s801_s27 = int_to_ptr.hbm [resolvable:$true] %s289_s27 }
  0xda   : > { %s531_s29 = sshra.s32 %s799_s11, 4  ;;  %s533_s23 = sshrl.u32 %s396_s28, 4  ;;  %s532_s29 = int_to_ptr.vmem [resolvable:$true] %s531_s29 }
  0xdb   : > { %s538_s26 = scalar_lea.vmem %s532_s29, %s533_s23  ;;  %s620_s16 = smov [#allocation7]  }
  0xdc   : > { %p539_p11 = scmp.ne.s32.totalorder %s532_s29, %s538_s26  ;;  %s542_s22 = scalar_lea.vmem %s620_s16, 32 }
  0xdd   : > { %p544_p9 = scmp.lt.s32.totalorder %s542_s22, %s538_s26 }
  0xde   : > { %p540_p2 = pnand %p539_p11, %p791_p13 }
  0xe0   : > { %p541_p5 = pneg %p540_p2 }
  0xe2   : > { %p546_p10 = pnand %p544_p9, %p541_p5 }
  0xe4   : > { %549 = shalt.err (!%p546_p10)
}
  0xe5   : > { %s550_s10 = sshra.s32 %s801_s27, 4  ;;  %s561_s24 = scalar_lea.hbm %s847_s3, 24  ;;  %s551_s10 = int_to_ptr.hbm [resolvable:$true] %s550_s10 }
  0xe6   : > { %s557_s6 = scalar_lea.hbm %s551_s10, %s533_s23  ;;  %p562_p7 = scmp.lt.s32.totalorder %s551_s10, %s847_s3 }
  0xe7   : > { %p558_p1 = scmp.ne.s32.totalorder %s551_s10, %s557_s6  ;;  %p563_p8 = scmp.lt.s32.totalorder %s561_s24, %s557_s6 }
  0xe9   : > { %p559_p0 = pnand %p558_p1, %p791_p13  ;;  %p564_p4 = por %p563_p8, %p562_p7 }
  0xeb   : > { %p560_p3 = pneg %p559_p0 }
  0xed   : > { %p565_p12 = pnand %p564_p4, %p560_p3 }
  0xef   : > { %568 = shalt.err (!%p565_p12)
}
  0xf0   : > { %s621_s8 = smov 128   ;;  %s622_s29 = smov 8  }
  0xf1   : > { %295 = dma.vmem_to_hbm [thread:$0]  (%p791_p13), %s799_s11, %s396_s28, %s801_s27, %s268_s20, %s621_s8, %s621_s8, %s622_s29  }
  0xf2 PF: > { %s304_s23 = sand.u32 1, %s600_s12   ;;  %p859_p6 = scmp.ne.s32.totalorder %s853_s25, 0 }
  0xf3   : > { %p860_p11 = scmp.ge.s32.totalorder %s612_s15, 2  ;;  %s305_s26 = scalar_lea.sflag [#allocation4], %s304_s23 }
  0xf5   : > { %p416_p2 = pnand %p860_p11, %p859_p6 }
  0xf7   : > { %p417_p5 = pneg %p416_p2 }
  0xf9   : > { %595 = dma.done.wait (%p417_p5), %s305_s26, 256  }
  0xfa   : > { %597 = vsyncadd (%p417_p5), %s305_s26, 4294967040  ;;  %p17_p9 = scmp.ge.s32.totalorder %s668_s18, 4   ;;  %s861_s12 = smov %s604_s13 }
  0xfb   : > { %s862_s13 = smov %s608_s14  ;;  %s863_s14 = smov %s680_s21 }
  0xfc   : > { %s864_s15 = smov %s668_s18  ;;  %19 = sbr.rel (!%p17_p9) target bundleno = 6 (0x6), region = 81 }
 0x101   :  { %311 = vsyncpa [#allocation3], 1 }
 0x102   :  { %313 = vsyncpa [#allocation3 + $0x1], 1 }
 0x103   :  { %314 = vsyncpa [#allocation6], 1 }
 0x104   :  { %315 = vsyncpa [#allocation4], 1 }
 0x105   :  { %317 = vsyncpa [#allocation4 + $0x1], 1 }

// kernel: tpu_custom_call.1
= control target key start
LH: loop header
LB: loop body
LE: loop exit
PB: predicated region body
PF: predicated region fallthrough
CT: control target
= control target key end

     0   :  { %8 = vsyncpa [#allocation3], 0  ;;  %s844_s0 = inlined_call_operand.hbm [shape: f32[20,32], index: 0, kind: input, shape index: {}]   ;;  %s845_s1 = inlined_call_operand.hbm [shape: f32[32,128], index: 1, kind: input, shape index: {}]   ;;  %s846_s2 = inlined_call_operand.vmem [shape: f32[1,128], index: 2, kind: input, shape index: {}]   ;;  %s847_s3 = inlined_call_operand.hbm [shape: f32[20,128], index: 3, kind: output, shape index: {}]  }
   0x1   :  { %10 = vsyncpa [#allocation3 + $0x1], 0 }
   0x2   :  { %11 = vsyncpa [#allocation6], 0 }
   0x3   :  { %12 = vsyncpa [#allocation4], 0 }
   0x4   :  { %14 = vsyncpa [#allocation4 + $0x1], 0  ;;  %s643_s12 = smov 0   ;;  %s645_s13 = smov 0  }
   0x5   :  { %s647_s14 = smov 0   ;;  %s649_s15 = smov 0  }
   0x6 LB: > { %s664_s16 = sadd.s32 4294967295, %s612_s15   ;;  %s373_s17 = sadd.s32 4294967294, %s612_s15   ;;  %s612_s15 = sphi %s649_s15, %s864_s15   ;;  %s608_s14 = sphi %s647_s14, %s863_s14   ;;  %s604_s13 = sphi %s645_s13, %s862_s13   ;;  %s600_s12 = sphi %s643_s12, %s861_s12  }
   0x7   : > { %s668_s18 = sadd.s32 1, %s612_s15   ;;  %s27_s19 = sadd.s32 1, %s608_s14 }
   0x8   : > { %s24_s20 = ssub.s32 %s612_s15, %s668_s18  ;;  %p34_p0 = scmp.ne.s32.totalorder %s608_s14, %s604_s13 }
   0x9   : > { %p25_p1 = scmp.eq.s32.totalorder %s24_s20, 0  ;;  %p35_p2 = scmp.eq.s32.totalorder %s612_s15, 0 }
   0xa   : > { %p40_p3 = scmp.ne.s32.totalorder %s604_s13, %s600_s12  ;;  %p849_p4 = scmp.eq.s32.totalorder %s664_s16, 0 }
   0xb   : > { %s680_s21 = scalar_select %p25_p1, %s608_s14, %s27_s19  }
   0xc   : > { %p682_p5 = por %p35_p2, %p34_p0  ;;  %p688_p6 = por %p849_p4, %p40_p3 }
   0xd   : > { %p106_p7 = scmp.eq.s32.totalorder %s664_s16, 1  ;;  %p112_p8 = scmp.eq.s32.totalorder %s373_s17, 1 }
   0xe   : > { %p374_p9 = scmp.ge.s32.totalorder %s612_s15, 1  ;;  %p119_p10 = scmp.lt.s32.totalorder %s612_s15, 3 }
   0xf   : > { %p695_p11 = por %p106_p7, %p34_p0  ;;  %p699_p12 = por %p112_p8, %p40_p3 }
  0x10   : > { %p703_p13 = pnand %p374_p9, %p119_p10  ;;  %s130_s29 = sshll.u32 %s845_s1, 4  ;;  %s131_s29 = int_to_ptr.hbm [resolvable:$true] %s130_s29 }
  0x11   : > { %s853_s25 = scalar_select %p699_p12, 1, 0 }
  0x12   : > { %p411_p1 = pneg %p703_p13  ;;  %s614_s30 = smov [#allocation5]  }
  0x13   : > { %s132_s4 = sshll.u32 %s614_s30, 4  ;;  %s615_s5 = smov 128   ;;  %s133_s4 = int_to_ptr.vmem [resolvable:$true] %s132_s4 }
  0x14   : > { %p412_p0 = pnand %p411_p1, %p849_p4  ;;  %s616_s6 = smov 8  }
  0x15   : > { %p848_p2 = scmp.ge.s32.totalorder %s612_s15, 2 }
  0x16   : > { %414 = dma.hbm_to_vmem [thread:$0]  (!%p412_p0), %s131_s29, 512, %s133_s4, [#allocation6], %s615_s5, %s615_s5, %s616_s6  }
  0x17   : > { %145 = sbr.rel (%p848_p2) target bundleno = 64 (0x40), region = 24 }
  0x1c   : > { %148 = sbr.rel (!%p682_p5) target bundleno = 64 (0x40), region = 28  ;;  %s149_s7 = sand.u32 (%p682_p5), 1, %s608_s14  }
  0x1d   : > { %s378_s8 = sshll.u32 (%p682_p5), %s612_s15, 1  ;;  %s377_s9 = sshll.u32 (%p682_p5), %s149_s7, 4 }
  0x1e   : > { %s155_s10 = ssub.s32 (%p682_p5), 3, %s378_s8  ;;  %s724_s20 = scalar_lea.sflag (%p682_p5), [#allocation3], %s149_s7 }
  0x1f   : > { %p156_p3 = scmp.lt.s32.totalorder (%p682_p5), %s155_s10, 2  ;;  %s153_s27 = scalar_lea.vmem (%p682_p5), [#allocation2], %s377_s9 }
  0x21   : > { %s866_s10 = smov (!%p156_p3, %s155_s10), 2 }
  0x22   : > { %s379_s11 = sshll.u32 %s866_s10, 3 }
  0x23   : > { %s159_s17 = ssub.s32 16, %s379_s11 }
  0x24   : > { %s160_s19 = sshll.u32 %s159_s17, 4 }
  0x25   : > { %161 = vsyncadd %s724_s20, %s160_s19  ;;  %p727_p5 = scmp.ne.s32.totalorder %s379_s11, 0  ;;  %s399_s28 = sshll.u32 %s612_s15, 4 }
  0x26   : > { %s164_s4 = scalar_lea.hbm %s844_s0, %s399_s28  ;;  %s735_s5 = sshll.u32 %s153_s27, 4  ;;  %s169_s5 = int_to_ptr.vmem [resolvable:$true] %s735_s5 }
  0x27   : > { %s166_s6 = sshll.u32 %s164_s4, 4  ;;  %s383_s7 = sshll.u32 %s866_s10, 7  ;;  %s738_s6 = int_to_ptr.hbm [resolvable:$true] %s166_s6 }
  0x28   : > { %s492_s8 = sshra.s32 %s738_s6, 4  ;;  %s494_s9 = sshrl.u32 %s383_s7, 4  ;;  %s493_s8 = int_to_ptr.hbm [resolvable:$true] %s492_s8 }
  0x29   : > { %s499_s11 = scalar_lea.hbm %s493_s8, %s494_s9  ;;  %s503_s27 = scalar_lea.hbm %s844_s0, 24 }
  0x2a   : > { %p500_p7 = scmp.ne.s32.totalorder %s493_s8, %s499_s11  ;;  %p504_p10 = scmp.lt.s32.totalorder %s493_s8, %s844_s0 }
  0x2b   : > { %p505_p1 = scmp.lt.s32.totalorder %s503_s27, %s499_s11 }
  0x2c   : > { %p501_p8 = pnand %p500_p7, %p727_p5 }
  0x2d   : > { %p506_p0 = por %p505_p1, %p504_p10 }
  0x2e   : > { %p502_p9 = pneg %p501_p8 }
  0x30   : > { %p507_p3 = pnand %p506_p0, %p502_p9 }
  0x32   : > { %510 = shalt.err (!%p507_p3)
}
  0x33   : > { %s511_s30 = sshra.s32 %s169_s5, 4  ;;  %s617_s17 = smov [#allocation2]   ;;  %s512_s30 = int_to_ptr.vmem [resolvable:$true] %s511_s30 }
  0x34   : > { %s518_s4 = scalar_lea.vmem %s512_s30, %s494_s9  ;;  %s522_s19 = scalar_lea.vmem %s617_s17, 32 }
  0x35   : > { %p519_p7 = scmp.ne.s32.totalorder %s512_s30, %s518_s4  ;;  %p524_p4 = scmp.lt.s32.totalorder %s522_s19, %s518_s4 }
  0x37   : > { %p520_p8 = pnand %p519_p7, %p727_p5 }
  0x39   : > { %p521_p2 = pneg %p520_p8 }
  0x3b   : > { %p526_p12 = pnand %p524_p4, %p521_p2 }
  0x3d   : > { %529 = shalt.err (!%p526_p12)
}
  0x3e   : > { %s618_s8 = smov 128   ;;  %s619_s11 = smov 8  }
  0x3f   : > { %174 = dma.hbm_to_vmem [thread:$0]  (%p727_p5), %s738_s6, %s383_s7, %s169_s5, %s724_s20, %s618_s8, %s618_s8, %s619_s11  }
  0x40 PF: > { %180 = sbr.rel (%p703_p13) target bundleno = 242 (0xf2), region = 32  ;;  %s767_s9 = sand.u32 (!%p703_p13), 1, %s604_s13  }
  0x41   : > { %s385_s27 = sshll.u32 (!%p703_p13), %s767_s9, 4  ;;  %s183_s28 = scalar_lea.sflag (!%p703_p13), [#allocation3], %s767_s9 }
  0x42   : > { %s186_s29 = scalar_lea.vmem (!%p703_p13), [#allocation2], %s385_s27 }
  0x45   : > { %587 = dma.done.wait (%p688_p6), %s183_s28, 256  }
  0x46   : > { %589 = vsyncadd (%p688_p6), %s183_s28, 4294967040  ;;  %p856_p4 = scmp.eq.s32.totalorder %s664_s16, 0 }
  0x48   : > { %591 = dma.done.wait (%p856_p4), [#allocation6], 512   ;;  %p857_p12 = pmov %p856_p4 }
  0x49   : > { %v230_v0 = vld [vmem:[#allocation5 + $0x18] sm:$0xff]  ;;  %v229_v1 = vld [vmem:[#allocation5 + $0x10] sm:$0xff]  ;;  %v228_v2 = vld [vmem:[#allocation5 + $0x8] sm:$0xff]  ;;  %vm235_vm0 = vcmask 261120   ;;  %s214_s10 = scalar_lea.vmem [#allocation7], %s385_s27  ;;  %s268_s20 = scalar_lea.sflag [#allocation4], %s767_s9 }
  0x4a   : > { %593 = vsyncadd (%p857_p12), [#allocation6], 4294966784  ;;  %254 = vmatpush.msra.mxu0 %v230_v0  ;;  %401 = vmatpush.msra.mxu1 %v230_v0  ;;  %v227_v3 = vld [vmem:[#allocation5] sm:$0xff]  ;;  %v226_v5 = vld [vmem:[%s186_s29 + $0x8] sm:$0xff]  ;;  %s391_s22 = sshll.u32 (%p695_p11), %s664_s16, 1 }
  0x4b   : > { %v225_v4 = vld [vmem:[%s186_s29] sm:$0xff]  ;;  %s276_s5 = ssub.s32 (%p695_p11), 3, %s391_s22 }
  0x4c   : > { %255 = vmatpush.msra.mxu0 %v229_v1  ;;  %402 = vmatpush.msra.mxu1 %v229_v1  ;;  %v461_v6 = vld [vmem:[%s846_s2] ss:$0 sm:$0xff]  ;;  %p277_p6 = scmp.lt.s32.totalorder (%p695_p11), %s276_s5, 2 }
  0x4e   : > { %256 = vmatpush.msra.mxu0 %v228_v2  ;;  %403 = vmatpush.msra.mxu1 %v228_v2 }
  0x50   : > { %257 = vmatpush.msra.mxu0 %v227_v3  ;;  %404 = vmatpush.msra.mxu1 %v227_v3 }
  0x51   : > { %388 = vmatmul.msk.f32.vlgmr.msra.gmra.mxu0 %vm235_vm0, %v225_v4  ;;  %389 = vmatmul.msk.f32.vlgmr.msra.gmra.mxu1 %vm235_vm0, %v226_v5 }
  0xce   : > { %v259_v7 = vpop.f32.mrf.mxu0  ;;  %v262_v8 = vpop.f32.mrf.mxu1  ;;  %274 = sbr.rel (!%p695_p11) target bundleno = 242 (0xf2), region = 44 }
  0xcf   : > { %v260_v9 = vadd.f32 %v461_v6, %v259_v7  ;;  %v263_v10 = vadd.f32 %v461_v6, %v262_v8 }
  0xd1   : > { %265 = vst [vmem:[%s214_s10] sm:$0xff] %v260_v9 }
  0xd2   : > { %266 = vst [vmem:[%s214_s10 + $0x8] sm:$0xff] %v263_v10 }
  0xd3   : > { %s868_s5 = smov (!%p277_p6, %s276_s5), 2 }
  0xd4   : > { %s392_s6 = sshll.u32 %s868_s5, 3 }
  0xd5   : > { %s280_s7 = ssub.s32 16, %s392_s6 }
  0xd6   : > { %s281_s30 = sshll.u32 %s280_s7, 4 }
  0xd7   : > { %282 = vsyncadd %s268_s20, %s281_s30  ;;  %p791_p13 = scmp.ne.s32.totalorder %s392_s6, 0  ;;  %s400_s24 = sshll.u32 %s664_s16, 4 }
  0xd8   : > { %s285_s8 = scalar_lea.hbm %s847_s3, %s400_s24  ;;  %s287_s11 = sshll.u32 %s214_s10, 4  ;;  %s799_s11 = int_to_ptr.vmem [resolvable:$true] %s287_s11 }
  0xd9   : > { %s289_s27 = sshll.u32 %s285_s8, 4  ;;  %s396_s28 = sshll.u32 %s868_s5, 7  ;;  %s801_s27 = int_to_ptr.hbm [resolvable:$true] %s289_s27 }
  0xda   : > { %s531_s29 = sshra.s32 %s799_s11, 4  ;;  %s533_s23 = sshrl.u32 %s396_s28, 4  ;;  %s532_s29 = int_to_ptr.vmem [resolvable:$true] %s531_s29 }
  0xdb   : > { %s538_s26 = scalar_lea.vmem %s532_s29, %s533_s23  ;;  %s620_s16 = smov [#allocation7]  }
  0xdc   : > { %p539_p11 = scmp.ne.s32.totalorder %s532_s29, %s538_s26  ;;  %s542_s22 = scalar_lea.vmem %s620_s16, 32 }
  0xdd   : > { %p544_p9 = scmp.lt.s32.totalorder %s542_s22, %s538_s26 }
  0xde   : > { %p540_p2 = pnand %p539_p11, %p791_p13 }
  0xe0   : > { %p541_p5 = pneg %p540_p2 }
  0xe2   : > { %p546_p10 = pnand %p544_p9, %p541_p5 }
  0xe4   : > { %549 = shalt.err (!%p546_p10)
}
  0xe5   : > { %s550_s10 = sshra.s32 %s801_s27, 4  ;;  %s561_s24 = scalar_lea.hbm %s847_s3, 24  ;;  %s551_s10 = int_to_ptr.hbm [resolvable:$true] %s550_s10 }
  0xe6   : > { %s557_s6 = scalar_lea.hbm %s551_s10, %s533_s23  ;;  %p562_p7 = scmp.lt.s32.totalorder %s551_s10, %s847_s3 }
  0xe7   : > { %p558_p1 = scmp.ne.s32.totalorder %s551_s10, %s557_s6  ;;  %p563_p8 = scmp.lt.s32.totalorder %s561_s24, %s557_s6 }
  0xe9   : > { %p559_p0 = pnand %p558_p1, %p791_p13  ;;  %p564_p4 = por %p563_p8, %p562_p7 }
  0xeb   : > { %p560_p3 = pneg %p559_p0 }
  0xed   : > { %p565_p12 = pnand %p564_p4, %p560_p3 }
  0xef   : > { %568 = shalt.err (!%p565_p12)
}
  0xf0   : > { %s621_s8 = smov 128   ;;  %s622_s29 = smov 8  }
  0xf1   : > { %295 = dma.vmem_to_hbm [thread:$0]  (%p791_p13), %s799_s11, %s396_s28, %s801_s27, %s268_s20, %s621_s8, %s621_s8, %s622_s29  }
  0xf2 PF: > { %s304_s23 = sand.u32 1, %s600_s12   ;;  %p859_p6 = scmp.ne.s32.totalorder %s853_s25, 0 }
  0xf3   : > { %p860_p11 = scmp.ge.s32.totalorder %s612_s15, 2  ;;  %s305_s26 = scalar_lea.sflag [#allocation4], %s304_s23 }
  0xf5   : > { %p416_p2 = pnand %p860_p11, %p859_p6 }
  0xf7   : > { %p417_p5 = pneg %p416_p2 }
  0xf9   : > { %595 = dma.done.wait (%p417_p5), %s305_s26, 256  }
  0xfa   : > { %597 = vsyncadd (%p417_p5), %s305_s26, 4294967040  ;;  %p17_p9 = scmp.ge.s32.totalorder %s668_s18, 4   ;;  %s861_s12 = smov %s604_s13 }
  0xfb   : > { %s862_s13 = smov %s608_s14  ;;  %s863_s14 = smov %s680_s21 }
  0xfc   : > { %s864_s15 = smov %s668_s18  ;;  %19 = sbr.rel (!%p17_p9) target bundleno = 6 (0x6), region = 81 }
 0x101   :  { %311 = vsyncpa [#allocation3], 1 }
 0x102   :  { %313 = vsyncpa [#allocation3 + $0x1], 1 }
 0x103   :  { %314 = vsyncpa [#allocation6], 1 }
 0x104   :  { %315 = vsyncpa [#allocation4], 1 }
 0x105   :  { %317 = vsyncpa [#allocation4 + $0x1], 1 }

</bundles_post_ra>
